<compile_context>
chip_gen: v5e
topology: v5e:2x2
jax: 0.10.0
libtpu: 0.0.40
codegen_flags: <defaults>
</compile_context>

<pallas_src>
import jax
import jax.numpy as jnp
from jax import lax
from jax.experimental import pallas as pl
from jax.experimental.pallas import tpu as pltpu


# ----------------------------- Pallas kernel --------------------------------

def _make_fused_kernel(W1, M1p):
    # Tap order t = di*3 + dj must match the host-side w2 reshape.
    tap_plan = []
    for di in range(3):
        for dj in range(3):
            off = (di - 1) * W1 + (dj - 1)      # flat y1-index offset of tap
            tap_plan.append((dj, (-off) % M1p))  # (which masked source, roll)

    def kernel(xt_ref, w1_ref, b1_ref, w2_ref, b2_ref, w3_ref, b3_ref,
               msk_ref, o_ref):
        # ---- conv1 (+ folded BN) + ReLU : one GEMM, bf16 ops, f32 acc -------
        y1 = jnp.dot(w1_ref[...], xt_ref[0],
                     preferred_element_type=jnp.float32)       # (out_c, M1p)
        y1 = jnp.maximum(y1 + b1_ref[...], 0.0)                # f32

        # ---- masked source copies for the 9 conv2 taps ----------------------
        # row 0: valid lanes (m < M1); row 1: valid & col != W1-1 (dj=0 taps);
        # row 2: valid & col != 0 (dj=2 taps).
        src_l = y1 * msk_ref[1:2, :]
        src_c = y1 * msk_ref[0:1, :]
        src_r = y1 * msk_ref[2:3, :]
        srcs = (src_l, src_c, src_r)

        # ---- conv2 (3x3, s1, p1): 9 rolled taps -> ONE stacked-K GEMM -------
        taps = []
        for dj, shift in tap_plan:
            src = srcs[dj]
            taps.append(src if shift == 0 else pltpu.roll(src, shift, 1))
        stacked = jnp.concatenate(taps, axis=0).astype(jnp.bfloat16)  # (9*out_c, M1p)

        y2 = jnp.dot(w2_ref[...], stacked,
                     preferred_element_type=jnp.float32)       # (mid_c, M1p)
        y2 = jnp.maximum(y2 + b2_ref[...], 0.0)                # f32

        # ---- conv3 (1x1) + BN bias + residual + final ReLU ------------------
        out = jnp.dot(w3_ref[...], y2.astype(jnp.bfloat16),
                      preferred_element_type=jnp.float32) + b3_ref[...] + y1
        o_ref[0] = jnp.maximum(out, 0.0).astype(o_ref.dtype)

    return kernel


# ------------------------------ JAX wrapper ----------------------------------

def res_bn_down_forward(x_nchw, p, k_size, stride, pad, eps=1e-5):
    N, C_in, H, W = x_nchw.shape
    kh, kw = k_size
    sh, sw = stride
    ph, pw = pad
    out_c = p['w1'].shape[0]
    mid_c = out_c // 2
    H1 = (H + 2 * ph - kh) // sh + 1
    W1 = (W + 2 * pw - kw) // sw + 1
    M1 = H1 * W1
    K1 = kh * kw * C_in
    f32, bf16 = jnp.float32, jnp.bfloat16

    # Lane-pad spatial axis to a multiple of 128 with >= W1+1 slack lanes so
    # the roll-based conv2 row halos land in zeroed padding.  K1 -> mult of 8.
    M1p = ((M1 + 127) // 128) * 128
    while M1p - M1 < W1 + 1:
        M1p += 128
    K1p = ((K1 + 7) // 8) * 8

    # ---- host-side prep: conv1 taps (strided slices), bf16, zero-padded -----
    x_p = jnp.pad(x_nchw, ((0, 0), (0, 0), (ph, ph), (pw, pw)))
    taps = []
    for i in range(kh):
        for j in range(kw):
            taps.append(x_p[:, :, i:i + sh * (H1 - 1) + 1:sh,
                                  j:j + sw * (W1 - 1) + 1:sw])
    x_taps = jnp.concatenate(taps, axis=1).reshape(N, K1, M1)
    x_taps = jnp.pad(x_taps, ((0, 0), (0, K1p - K1), (0, M1p - M1))).astype(bf16)

    # ---- fold BN (inference mode) into weights / biases ---------------------
    def fold(gamma, beta, mean, var, conv_b):
        s = gamma / jnp.sqrt(var + eps)
        return s, beta + s * (conv_b - mean)

    s1, bias1 = fold(p['g1'], p['be1'], p['m1'], p['v1'], p['b1'])
    s2, bias2 = fold(p['g2'], p['be2'], p['m2'], p['v2'], p['b2'])
    s3, bias3 = fold(p['g3'], p['be3'], p['m3'], p['v3'], p['b3'])

    # transposed (C_out-major), folded, bf16 weights
    w1m = jnp.transpose(p['w1'], (0, 2, 3, 1)).reshape(out_c, K1) * s1[:, None]
    w1m = jnp.pad(w1m, ((0, 0), (0, K1p - K1))).astype(bf16)        # (out_c, K1p)
    w2s = (jnp.transpose(p['w2'], (0, 2, 3, 1)).reshape(mid_c, 9 * out_c)
           * s2[:, None]).astype(bf16)                               # (mid_c, 9*out_c)
    w3m = (p['w3'][:, :, 0, 0] * s3[:, None]).astype(bf16)          # (out_c, mid_c)
    b1c = bias1[:, None].astype(f32)
    b2c = bias2[:, None].astype(f32)
    b3c = bias3[:, None].astype(f32)

    # ---- lane masks: valid lanes / column-halo sources for conv2 ------------
    lane = jnp.arange(M1p)
    col = lane % W1
    valid = lane < M1
    mv = valid.astype(f32)                                 # m < M1
    ml = (valid & (col != W1 - 1)).astype(f32)             # source of dj=0 taps
    mr = (valid & (col != 0)).astype(f32)                  # source of dj=2 taps
    masks = jnp.zeros((8, M1p), f32).at[0].set(mv).at[1].set(ml).at[2].set(mr)

    kernel = _make_fused_kernel(W1, M1p)

    out_flat = pl.pallas_call(
        kernel,
        out_shape=jax.ShapeDtypeStruct((N, out_c, M1p), f32),
        grid=(N,),
        in_specs=[
            pl.BlockSpec((1, K1p, M1p), lambda n: (n, 0, 0)),     # conv1 taps (bf16)
            pl.BlockSpec((out_c, K1p), lambda n: (0, 0)),         # w1 folded
            pl.BlockSpec((out_c, 1), lambda n: (0, 0)),           # b1
            pl.BlockSpec((mid_c, 9 * out_c), lambda n: (0, 0)),   # w2 stacked-K
            pl.BlockSpec((mid_c, 1), lambda n: (0, 0)),           # b2
            pl.BlockSpec((out_c, mid_c), lambda n: (0, 0)),       # w3
            pl.BlockSpec((out_c, 1), lambda n: (0, 0)),           # b3
            pl.BlockSpec((8, M1p), lambda n: (0, 0)),             # lane masks
        ],
        out_specs=pl.BlockSpec((1, out_c, M1p), lambda n: (n, 0, 0)),
        compiler_params=pltpu.CompilerParams(
            dimension_semantics=("parallel",)),
    )(x_taps, w1m, b1c, w2s, b2c, w3m, b3c, masks)

    # lane-dense (N, out_c, M1p) -> NCHW (drop padded tail lanes)
    return out_flat[:, :, :M1].reshape(N, out_c, H1, W1)


# --------------------------- pure-JAX reference ------------------------------

def ref_forward(x, p, stride, pad):
    def conv(x, w, b, st, pd):
        y = lax.conv_general_dilated(
            x, w, window_strides=st,
            padding=[(pd[0], pd[0]), (pd[1], pd[1])],
            dimension_numbers=('NCHW', 'OIHW', 'NCHW'))
        return y + b.reshape(1, -1, 1, 1)

    def bn(x, g, be, m, v, eps=1e-5):
        r = lambda t: t.reshape(1, -1, 1, 1)
        return r(g) * (x - r(m)) / jnp.sqrt(r(v) + eps) + r(be)

    x1 = jax.nn.relu(bn(conv(x, p['w1'], p['b1'], stride, pad),
                        p['g1'], p['be1'], p['m1'], p['v1']))
    h = jax.nn.relu(bn(conv(x1, p['w2'], p['b2'], (1, 1), (1, 1)),
                       p['g2'], p['be2'], p['m2'], p['v2']))
    h = bn(conv(h, p['w3'], p['b3'], (1, 1), (0, 0)),
           p['g3'], p['be3'], p['m3'], p['v3'])
    return jax.nn.relu(x1 + h)


# --------------------------------- main --------------------------------------

if __name__ == "__main__":
    key = jax.random.PRNGKey(0)
    in_c, out_c = 4, 8
    k_size, stride, pad = (3, 3), (2, 2), (1, 1)
    N, H, W = 2, 16, 16

    keys = jax.random.split(key, 20)
    nrm = lambda k, shape, s=0.1: s * jax.random.normal(k, shape, jnp.float32)
    uni = lambda k, shape: jax.random.uniform(k, shape, jnp.float32, 0.5, 1.5)

    p = {
        'w1': nrm(keys[0], (out_c, in_c, 3, 3)),
        'b1': nrm(keys[1], (out_c,)),
        'g1': 1.0 + nrm(keys[2], (out_c,)),
        'be1': nrm(keys[3], (out_c,)),
        'm1': nrm(keys[4], (out_c,)),
        'v1': uni(keys[5], (out_c,)),
        'w2': nrm(keys[6], (out_c // 2, out_c, 3, 3)),
        'b2': nrm(keys[7], (out_c // 2,)),
        'g2': 1.0 + nrm(keys[8], (out_c // 2,)),
        'be2': nrm(keys[9], (out_c // 2,)),
        'm2': nrm(keys[10], (out_c // 2,)),
        'v2': uni(keys[11], (out_c // 2,)),
        'w3': nrm(keys[12], (out_c, out_c // 2, 1, 1)),
        'b3': nrm(keys[13], (out_c,)),
        'g3': 1.0 + nrm(keys[14], (out_c,)),
        'be3': nrm(keys[15], (out_c,)),
        'm3': nrm(keys[16], (out_c,)),
        'v3': uni(keys[17], (out_c,)),
    }
    x = jax.random.normal(keys[18], (N, in_c, H, W), jnp.float32)

    out = res_bn_down_forward(x, p, k_size, stride, pad)
    out = jax.block_until_ready(out)

    ref = ref_forward(x, p, stride, pad)
    assert out.shape == ref.shape == (N, out_c, H // 2, W // 2), out.shape
    err = float(jnp.max(jnp.abs(out - ref)))
    # bf16 matmul operands (per perf review) -> tolerance loosened from 1e-4.
    assert jnp.allclose(out, ref, rtol=3e-2, atol=3e-2), err
    print("KERNEL_OK")
</pallas_src>

<mosaic_0001>
module attributes {stable_mosaic.version = 11 : i64} {
  func.func @kernel(%arg0: i32, %arg1: memref<1x40x128xbf16, #tpu.memory_space<vmem>>, %arg2: memref<8x40xbf16, #tpu.memory_space<vmem>>, %arg3: memref<8x1xf32, #tpu.memory_space<vmem>>, %arg4: memref<4x72xbf16, #tpu.memory_space<vmem>>, %arg5: memref<4x1xf32, #tpu.memory_space<vmem>>, %arg6: memref<8x4xbf16, #tpu.memory_space<vmem>>, %arg7: memref<8x1xf32, #tpu.memory_space<vmem>>, %arg8: memref<8x128xf32, #tpu.memory_space<vmem>>, %arg9: memref<1x8x128xf32, #tpu.memory_space<vmem>>) attributes {dimension_semantics = [#tpu.dimension_semantics<parallel>], iteration_bounds = array<i64: 2>, scalar_prefetch = 0 : i64, scratch_operands = 0 : i64, tpu.core_type = #tpu.core_type<tc>, window_params = [{transform_indices = @transform_0, window_bounds = array<i64: 1, 40, 128>}, {pipeline_mode = #tpu.pipeline_mode<synchronous>, transform_indices = @transform_1, window_bounds = array<i64: 8, 40>}, {pipeline_mode = #tpu.pipeline_mode<synchronous>, transform_indices = @transform_2, window_bounds = array<i64: 8, 1>}, {pipeline_mode = #tpu.pipeline_mode<synchronous>, transform_indices = @transform_3, window_bounds = array<i64: 4, 72>}, {pipeline_mode = #tpu.pipeline_mode<synchronous>, transform_indices = @transform_4, window_bounds = array<i64: 4, 1>}, {pipeline_mode = #tpu.pipeline_mode<synchronous>, transform_indices = @transform_5, window_bounds = array<i64: 8, 4>}, {pipeline_mode = #tpu.pipeline_mode<synchronous>, transform_indices = @transform_6, window_bounds = array<i64: 8, 1>}, {pipeline_mode = #tpu.pipeline_mode<synchronous>, transform_indices = @transform_7, window_bounds = array<i64: 8, 128>}, {transform_indices = @transform_8, window_bounds = array<i64: 1, 8, 128>}]} {
    %c0 = arith.constant 0 : index
    %c0_0 = arith.constant 0 : index
    %0 = vector.load %arg2[%c0, %c0_0] : memref<8x40xbf16, #tpu.memory_space<vmem>>, vector<8x40xbf16>
    %c0_1 = arith.constant 0 : index
    %c0_2 = arith.constant 0 : index
    %c0_3 = arith.constant 0 : index
    %1 = vector.load %arg1[%c0_1, %c0_2, %c0_3] : memref<1x40x128xbf16, #tpu.memory_space<vmem>>, vector<1x40x128xbf16>
    %2 = vector.shape_cast %1 : vector<1x40x128xbf16> to vector<40x128xbf16>
    %cst = arith.constant dense<0.000000e+00> : vector<8x128xf32>
    %3 = tpu.matmul %0, %2, %cst {dimension_numbers = #tpu.dot_dimension_numbers<[1], [0], [0], [1], [0, 0, 1, 1], [], []>} : vector<8x40xbf16>, vector<40x128xbf16>, vector<8x128xf32> -> vector<8x128xf32>
    %c0_4 = arith.constant 0 : index
    %c0_5 = arith.constant 0 : index
    %4 = vector.load %arg3[%c0_4, %c0_5] : memref<8x1xf32, #tpu.memory_space<vmem>>, vector<8x1xf32>
    %5 = vector.broadcast %4 : vector<8x1xf32> to vector<8x128xf32>
    %6 = arith.addf %3, %5 : vector<8x128xf32>
    %cst_6 = arith.constant 0.000000e+00 : f32
    %7 = vector.broadcast %cst_6 : f32 to vector<8x128xf32>
    %8 = arith.maximumf %6, %7 : vector<8x128xf32>
    %c1 = arith.constant 1 : index
    %c0_7 = arith.constant 0 : index
    %9 = vector.load %arg8[%c1, %c0_7] : memref<8x128xf32, #tpu.memory_space<vmem>>, vector<1x128xf32>
    %10 = vector.broadcast %9 : vector<1x128xf32> to vector<8x128xf32>
    %11 = arith.mulf %8, %10 : vector<8x128xf32>
    %c0_8 = arith.constant 0 : index
    %c0_9 = arith.constant 0 : index
    %12 = vector.load %arg8[%c0_8, %c0_9] : memref<8x128xf32, #tpu.memory_space<vmem>>, vector<1x128xf32>
    %13 = vector.broadcast %12 : vector<1x128xf32> to vector<8x128xf32>
    %14 = arith.mulf %8, %13 : vector<8x128xf32>
    %c2 = arith.constant 2 : index
    %c0_10 = arith.constant 0 : index
    %15 = vector.load %arg8[%c2, %c0_10] : memref<8x128xf32, #tpu.memory_space<vmem>>, vector<1x128xf32>
    %16 = vector.broadcast %15 : vector<1x128xf32> to vector<8x128xf32>
    %17 = arith.mulf %8, %16 : vector<8x128xf32>
    %c9_i32 = arith.constant 9 : i32
    %18 = tpu.dynamic_rotate %11 by %c9_i32 dim 1 : vector<8x128xf32>, i32 -> vector<8x128xf32>
    %c8_i32 = arith.constant 8 : i32
    %19 = tpu.dynamic_rotate %14 by %c8_i32 dim 1 : vector<8x128xf32>, i32 -> vector<8x128xf32>
    %c7_i32 = arith.constant 7 : i32
    %20 = tpu.dynamic_rotate %17 by %c7_i32 dim 1 : vector<8x128xf32>, i32 -> vector<8x128xf32>
    %c1_i32 = arith.constant 1 : i32
    %21 = tpu.dynamic_rotate %11 by %c1_i32 dim 1 : vector<8x128xf32>, i32 -> vector<8x128xf32>
    %c127_i32 = arith.constant 127 : i32
    %22 = tpu.dynamic_rotate %17 by %c127_i32 dim 1 : vector<8x128xf32>, i32 -> vector<8x128xf32>
    %c121_i32 = arith.constant 121 : i32
    %23 = tpu.dynamic_rotate %11 by %c121_i32 dim 1 : vector<8x128xf32>, i32 -> vector<8x128xf32>
    %c120_i32 = arith.constant 120 : i32
    %24 = tpu.dynamic_rotate %14 by %c120_i32 dim 1 : vector<8x128xf32>, i32 -> vector<8x128xf32>
    %c119_i32 = arith.constant 119 : i32
    %25 = tpu.dynamic_rotate %17 by %c119_i32 dim 1 : vector<8x128xf32>, i32 -> vector<8x128xf32>
    %26 = tpu.concatenate %18, %19, %20, %21, %14, %22, %23, %24, %25 in 0 : vector<8x128xf32>, vector<8x128xf32>, vector<8x128xf32>, vector<8x128xf32>, vector<8x128xf32>, vector<8x128xf32>, vector<8x128xf32>, vector<8x128xf32>, vector<8x128xf32> -> vector<72x128xf32>
    %27 = arith.truncf %26 : vector<72x128xf32> to vector<72x128xbf16>
    %c0_11 = arith.constant 0 : index
    %c0_12 = arith.constant 0 : index
    %28 = vector.load %arg4[%c0_11, %c0_12] : memref<4x72xbf16, #tpu.memory_space<vmem>>, vector<4x72xbf16>
    %cst_13 = arith.constant dense<0.000000e+00> : vector<4x128xf32>
    %29 = tpu.matmul %28, %27, %cst_13 {dimension_numbers = #tpu.dot_dimension_numbers<[1], [0], [0], [1], [0, 0, 1, 1], [], []>} : vector<4x72xbf16>, vector<72x128xbf16>, vector<4x128xf32> -> vector<4x128xf32>
    %c0_14 = arith.constant 0 : index
    %c0_15 = arith.constant 0 : index
    %30 = vector.load %arg5[%c0_14, %c0_15] : memref<4x1xf32, #tpu.memory_space<vmem>>, vector<4x1xf32>
    %31 = vector.broadcast %30 : vector<4x1xf32> to vector<4x128xf32>
    %32 = arith.addf %29, %31 : vector<4x128xf32>
    %cst_16 = arith.constant 0.000000e+00 : f32
    %33 = vector.broadcast %cst_16 : f32 to vector<4x128xf32>
    %34 = arith.maximumf %32, %33 : vector<4x128xf32>
    %c0_17 = arith.constant 0 : index
    %c0_18 = arith.constant 0 : index
    %35 = vector.load %arg6[%c0_17, %c0_18] : memref<8x4xbf16, #tpu.memory_space<vmem>>, vector<8x4xbf16>
    %36 = arith.truncf %34 : vector<4x128xf32> to vector<4x128xbf16>
    %cst_19 = arith.constant dense<0.000000e+00> : vector<8x128xf32>
    %37 = tpu.matmul %35, %36, %cst_19 {dimension_numbers = #tpu.dot_dimension_numbers<[1], [0], [0], [1], [0, 0, 1, 1], [], []>} : vector<8x4xbf16>, vector<4x128xbf16>, vector<8x128xf32> -> vector<8x128xf32>
    %c0_20 = arith.constant 0 : index
    %c0_21 = arith.constant 0 : index
    %38 = vector.load %arg7[%c0_20, %c0_21] : memref<8x1xf32, #tpu.memory_space<vmem>>, vector<8x1xf32>
    %39 = vector.broadcast %38 : vector<8x1xf32> to vector<8x128xf32>
    %40 = arith.addf %37, %39 : vector<8x128xf32>
    %41 = arith.addf %40, %8 : vector<8x128xf32>
    %cst_22 = arith.constant 0.000000e+00 : f32
    %42 = vector.broadcast %cst_22 : f32 to vector<8x128xf32>
    %43 = arith.maximumf %41, %42 : vector<8x128xf32>
    %c0_23 = arith.constant 0 : index
    %c0_24 = arith.constant 0 : index
    %c0_25 = arith.constant 0 : index
    %44 = vector.load %arg9[%c0_23, %c0_24, %c0_25] : memref<1x8x128xf32, #tpu.memory_space<vmem>>, vector<1x8x128xf32>
    %45 = vector.shape_cast %44 : vector<1x8x128xf32> to vector<8x128xf32>
    %46 = vector.shape_cast %43 : vector<8x128xf32> to vector<1x8x128xf32>
    tpu.vector_store %arg9[%c0_23, %c0_24, %c0_25], %46 {strides = array<i32>} : memref<1x8x128xf32, #tpu.memory_space<vmem>>, vector<1x8x128xf32>,
    return
  }
  func.func @transform_0(%arg0: i32) -> (i32, i32, i32) {
    %c0_i32 = arith.constant 0 : i32
    %c0_i32_0 = arith.constant 0 : i32
    %c0_i32_1 = arith.constant 0 : i32
    return %arg0, %c0_i32, %c0_i32_0 : i32, i32, i32
  }
  func.func @transform_1(%arg0: i32) -> (i32, i32) {
    %c0_i32 = arith.constant 0 : i32
    %c0_i32_0 = arith.constant 0 : i32
    %c0_i32_1 = arith.constant 0 : i32
    return %c0_i32, %c0_i32_0 : i32, i32
  }
  func.func @transform_2(%arg0: i32) -> (i32, i32) {
    %c0_i32 = arith.constant 0 : i32
    %c0_i32_0 = arith.constant 0 : i32
    %c0_i32_1 = arith.constant 0 : i32
    return %c0_i32, %c0_i32_0 : i32, i32
  }
  func.func @transform_3(%arg0: i32) -> (i32, i32) {
    %c0_i32 = arith.constant 0 : i32
    %c0_i32_0 = arith.constant 0 : i32
    %c0_i32_1 = arith.constant 0 : i32
    return %c0_i32, %c0_i32_0 : i32, i32
  }
  func.func @transform_4(%arg0: i32) -> (i32, i32) {
    %c0_i32 = arith.constant 0 : i32
    %c0_i32_0 = arith.constant 0 : i32
    %c0_i32_1 = arith.constant 0 : i32
    return %c0_i32, %c0_i32_0 : i32, i32
  }
  func.func @transform_5(%arg0: i32) -> (i32, i32) {
    %c0_i32 = arith.constant 0 : i32
    %c0_i32_0 = arith.constant 0 : i32
    %c0_i32_1 = arith.constant 0 : i32
    return %c0_i32, %c0_i32_0 : i32, i32
  }
  func.func @transform_6(%arg0: i32) -> (i32, i32) {
    %c0_i32 = arith.constant 0 : i32
    %c0_i32_0 = arith.constant 0 : i32
    %c0_i32_1 = arith.constant 0 : i32
    return %c0_i32, %c0_i32_0 : i32, i32
  }
  func.func @transform_7(%arg0: i32) -> (i32, i32) {
    %c0_i32 = arith.constant 0 : i32
    %c0_i32_0 = arith.constant 0 : i32
    %c0_i32_1 = arith.constant 0 : i32
    return %c0_i32, %c0_i32_0 : i32, i32
  }
  func.func @transform_8(%arg0: i32) -> (i32, i32, i32) {
    %c0_i32 = arith.constant 0 : i32
    %c0_i32_0 = arith.constant 0 : i32
    %c0_i32_1 = arith.constant 0 : i32
    return %arg0, %c0_i32, %c0_i32_0 : i32, i32, i32
  }
}

</mosaic_0001>

<bundles_post_ra>
// kernel: tpu_custom_call.1
= control target key start
LH: loop header
LB: loop body
LE: loop exit
PB: predicated region body
PF: predicated region fallthrough
CT: control target
= control target key end

     0   :  { %13 = vsyncpa [#allocation3], 0  ;;  %s947_s0 = inlined_call_operand.hbm [shape: bf16[2,40,128], index: 0, kind: input, shape index: {}]   ;;  %s948_s1 = inlined_call_operand.vmem [shape: bf16[8,40], index: 1, kind: input, shape index: {}]   ;;  %s949_s2 = inlined_call_operand.vmem [shape: f32[8,1], index: 2, kind: input, shape index: {}]   ;;  %s950_s3 = inlined_call_operand.vmem [shape: bf16[4,72], index: 3, kind: input, shape index: {}]   ;;  %s951_s4 = inlined_call_operand.vmem [shape: f32[4,1], index: 4, kind: input, shape index: {}]   ;;  %s952_s5 = inlined_call_operand.vmem [shape: bf16[8,4], index: 5, kind: input, shape index: {}]   ;;  %s953_s6 = inlined_call_operand.vmem [shape: f32[8,1], index: 6, kind: input, shape index: {}]   ;;  %s954_s7 = inlined_call_operand.vmem [shape: f32[8,128], index: 7, kind: input, shape index: {}]   ;;  %s955_s8 = inlined_call_operand.hbm [shape: f32[2,8,128], index: 8, kind: output, shape index: {}]  }
   0x1   :  { %15 = vsyncpa [#allocation3 + $0x1], 0 }
   0x2   :  { %16 = vsyncpa [#allocation4], 0 }
   0x3   :  { %18 = vsyncpa [#allocation4 + $0x1], 0  ;;  %s794_s27 = smov 0   ;;  %s796_s28 = smov 0  }
   0x4   :  { %s798_s29 = smov 0   ;;  %s800_s30 = smov 0  }
   0x5 LB: > { %959 = sst [smem:[#allocation8_spill]] %s732_s29  ;;  %s815_s9 = sadd.s32 4294967295, %s736_s30   ;;  %s736_s30 = sphi %s800_s30, %s966_s30   ;;  %s732_s29 = sphi %s798_s29, %s971_s29   ;;  %s728_s28 = sphi %s796_s28, %s970_s28   ;;  %s724_s27 = sphi %s794_s27, %s969_s27  }
   0x6   : > { %s552_s10 = sadd.s32 4294967294, %s736_s30   ;;  %s819_s11 = sadd.s32 1, %s736_s30  }
   0x7   : > { %960 = sst [smem:[#allocation9_spill]] %s819_s11  ;;  %s31_s12 = sadd.s32 1, %s732_s29 }
   0x8   : > { %s28_s13 = ssub.s32 %s736_s30, %s819_s11  ;;  %p38_p0 = scmp.ne.s32.totalorder %s732_s29, %s728_s28 }
   0x9   : > { %p29_p1 = scmp.eq.s32.totalorder %s28_s13, 0  ;;  %p39_p2 = scmp.eq.s32.totalorder %s736_s30, 0 }
   0xa   : > { %p44_p3 = scmp.ne.s32.totalorder %s728_s28, %s724_s27  ;;  %p45_p4 = scmp.eq.s32.totalorder %s815_s9, 0 }
   0xb   : > { %s831_s14 = scalar_select %p29_p1, %s732_s29, %s31_s12  }
   0xc   : > { %p40_p5 = por %p39_p2, %p38_p0  ;;  %p833_p6 = por %p45_p4, %p44_p3 }
   0xd   : > { %961 = sst [smem:[#allocation10_spill]] %s831_s14  ;;  %p215_p7 = scmp.eq.s32.totalorder %s815_s9, 1 }
   0xe   : > { %p221_p8 = scmp.eq.s32.totalorder %s552_s10, 1  ;;  %p554_p9 = scmp.ge.s32.totalorder %s736_s30, 2 }
   0xf   : > { %p590_p10 = scmp.lt.s32.totalorder %s736_s30, 2  ;;  %p840_p11 = por %p215_p7, %p38_p0 }
  0x10   : > { %p844_p12 = por %p221_p8, %p44_p3  ;;  %s262_s18 = sand.u32 1, %s732_s29  }
  0x11   : > { %s576_s19 = smul.u32 20, %s736_s30  ;;  %p853_p13 = pnand %p590_p10, %p40_p5 }
  0x12   : > { %s575_s20 = smul.u32 20, %s262_s18  ;;  %s263_s12 = scalar_lea.sflag [#allocation3], %s262_s18 }
  0x13   : > { %s271_s23 = scalar_lea.hbm %s947_s0, %s576_s19  ;;  %p644_p1 = pneg %p853_p13 }
  0x14   : > { %s272_s25 = sshll.u32 %s271_s23, 4  ;;  %s266_s26 = scalar_lea.vmem [#allocation2], %s575_s20  ;;  %s273_s25 = int_to_ptr.hbm [resolvable:$true] %s272_s25 }
  0x15   : > { %s274_s10 = sshll.u32 %s266_s26, 4  ;;  %s640_s13 = sshra.s32 %s273_s25, 4  ;;  %s275_s10 = int_to_ptr.vmem [resolvable:$true] %s274_s10  ;;  %s641_s13 = int_to_ptr.hbm [resolvable:$true] %s640_s13 }
  0x16   : > { %s642_s14 = scalar_lea.hbm %s641_s13, 20  ;;  %s647_s22 = scalar_lea.hbm %s947_s0, 40 }
  0x17   : > { %p643_p0 = scmp.ne.s32.totalorder %s641_s13, %s642_s14  ;;  %p648_p4 = scmp.lt.s32.totalorder %s641_s13, %s947_s0 }
  0x18   : > { %p649_p5 = scmp.lt.s32.totalorder %s647_s22, %s642_s14 }
  0x19   : > { %p645_p2 = pnand %p644_p1, %p643_p0 }
  0x1a   : > { %p650_p7 = por %p649_p5, %p648_p4 }
  0x1b   : > { %p646_p3 = pneg %p645_p2 }
  0x1d   : > { %p651_p8 = pnand %p650_p7, %p646_p3 }
  0x1f   : > { %654 = shalt.err (!%p651_p8)
}
  0x20   : > { %s738_s18 = smov 64   ;;  %s739_s20 = smov 4  }
  0x21   : > { %585 = dma.hbm_to_vmem [thread:$0]  (!%p853_p13), %s273_s25, 320, %s275_s10, %s263_s12, %s738_s18, %s738_s18, %s739_s20  }
  0x22   : > { %p556_p10 = scmp.ge.s32.totalorder %s736_s30, 1  ;;  %p282_p0 = scmp.lt.s32.totalorder %s736_s30, 3 }
  0x24   : > { %p283_p1 = pnand %p556_p10, %p282_p0 }
  0x25   : > { %s870_s23 = sand.u32 (!%p283_p1), 1, %s728_s28  }
  0x26   : > { %286 = sbr.rel (%p283_p1) target bundleno = 612 (0x264), region = 52  ;;  %s289_s11 = scalar_lea.sflag (!%p283_p1), [#allocation3], %s870_s23 }
  0x27   : > { %s577_s29 = smul.u32 (!%p283_p1), 20, %s870_s23 }
  0x29   : > { %s292_s14 = scalar_lea.vmem (!%p283_p1), [#allocation2], %s577_s29 }
  0x2b   : > { %715 = dma.done.wait (%p833_p6), %s289_s11, 320  }
  0x2c   : > { %717 = vsyncadd (%p833_p6), %s289_s11, 4294966976  ;;  %v740_v0 = vmov 0   ;;  %v332_v1 = vld [vmem:[%s292_s14 + $0x10] sm:$0xf]  ;;  %vm358_vm0 = vcmask 1043456   ;;  %v574_v6 = vld [vmem:[%s292_s14 + $0x8] sm:$0xff] }
  0x2d   : > { %635 = vset.pattern.permute.xlu0 %v740_v0  ;;  %636 = vset.pattern.permute.xlu1 %v740_v0  ;;  %v348_v2 = vunpack.c.l.b16 %v332_v1  ;;  %v333_v3 = vld [vmem:[%s949_s2] sm:$0xff]  ;;  %vm354_vm1 = vcmask 326656   ;;  %s741_s21 = smov 127   ;;  %s742_s22 = smov 119   ;;  %vm413_vm2 = vcmask 588800   ;;  %vm446_vm3 = vcmask 1041408  }
  0x2e   : > { %336 = vperm.xlu0 %635, %v333_v3   ;;  %v573_v7 = vld [vmem:[%s292_s14] sm:$0xff]  ;;  %s743_s18 = smov 121   ;;  %s744_s11 = smov 7   ;;  %vm442_vm4 = vcmask 31744  }
  0x2f   : > { %v351_v4 = vpack.c.b16 %v348_v2, %v348_v2  ;;  %v327_v8 = vld [vmem:[%s948_s1] sm:$0xf]  ;;  %s745_s14 = smov 1   ;;  %s746_s24 = smov 120  }
  0x30   : > { %v637_v12 = vld [vmem:[%s954_s7 + $0x2] ss:$0 sm:$0xff]  ;;  %v638_v13 = vld [vmem:[%s954_s7 + $0x1] ss:$0 sm:$0xff]  ;;  %v639_v18 = vld [vmem:[%s954_s7] ss:$0 sm:$0xff] }
  0x31   : > { %v360_v5 = vsel %vm358_vm0, %v351_v4, 0  ;;  %v407_v20 = vld [vmem:[%s951_s4] sm:$0xf]  ;;  %s747_s26 = smov 8   ;;  %s748_s10 = smov 9  }
  0x32   : > { %367 = vmatpush.bf16.msra.mxu0 %v360_v5  ;;  %v406_v35 = vld [vmem:[%s950_s3] sm:$0x3]  ;;  %s557_s20 = sshll.u32 %s870_s23, 3  ;;  %s570_s29 = sshll.u32 %s815_s9, 3 }
  0x33   : > { %v436_v36 = vld [vmem:[%s953_s6] sm:$0xff]  ;;  %s325_s25 = scalar_lea.vmem [#allocation5], %s557_s20 }
  0x34   : > { %v434_v44 = vld [vmem:[%s952_s5] sm:$0xf]  ;;  %s479_s15 = sshll.u32 %s325_s25, 4  ;;  %s480_s15 = int_to_ptr.vmem [resolvable:$true] %s479_s15 }
  0x36   : > { %368 = vmatpush.bf16.msra.mxu0 %v574_v6 }
  0x3a   : > { %369 = vmatpush.bf16.msra.mxu0 %v573_v7 }
  0x3d   : > { %566 = vmatmul.msk.bf16.vlgmr.msra.gmra.mxu0 %vm354_vm1, %v327_v8 }
  0xa0   : > { %v337_v9 = vpop.permute.xlu0 %336 }
  0xba   : > { %v371_v10 = vpop.f32.mrf.mxu0 }
  0xbb   : > { %v372_v11 = vadd.f32 %v371_v10, %v337_v9 }
  0xbd   : > { %v891_v14 = vmax.f32 %v372_v11, 0.0 }
  0xbf   : > { %v384_v15 = vmul.f32 %v637_v12, %v891_v14  ;;  %v378_v16 = vmul.f32 %v638_v13, %v891_v14  ;;  %v381_v19 = vmul.f32 %v639_v18, %v891_v14 }
  0xc1   : > { %393 = vrot.lane.b32.xlu2 %v384_v15, %s741_s21  ;;  %399 = vrot.lane.b32.xlu0 %v384_v15, %s742_s22  ;;  %s690_s21 = scalar_lea.hbm %s955_s8, 16 }
  0xc2   : > { %395 = vrot.lane.b32.xlu1 %v378_v16, %s743_s18  ;;  %v373_v17 = vpop.f32.mrf.mxu0 }
  0xc9   : > { %389 = vrot.lane.b32.xlu2 %v384_v15, %s744_s11  ;;  %391 = vrot.lane.b32.xlu0 %v378_v16, %s745_s14 }
  0xca   : > { %397 = vrot.lane.b32.xlu1 %v381_v19, %s746_s24  ;;  %s477_s24 = scalar_lea.hbm %s955_s8, %s570_s29 }
  0xd1   : > { %387 = vrot.lane.b32.xlu2 %v381_v19, %s747_s26  ;;  %410 = vperm.xlu0 %635, %v407_v20   ;;  %s481_s26 = sshll.u32 %s477_s24, 4  ;;  %s482_s26 = int_to_ptr.hbm [resolvable:$true] %s481_s26 }
  0xd2   : > { %385 = vrot.lane.b32.xlu1 %v378_v16, %s748_s10  ;;  %s467_s10 = scalar_lea.sflag [#allocation4], %s870_s23  ;;  %s684_s9 = sshra.s32 %s482_s26, 4  ;;  %s685_s9 = int_to_ptr.hbm [resolvable:$true] %s684_s9 }
  0xd3   : > { %s686_s12 = scalar_lea.hbm %s685_s9, 8  ;;  %p691_p3 = scmp.lt.s32.totalorder %s685_s9, %s955_s8 }
  0xd4   : > { %p687_p6 = scmp.ne.s32.totalorder %s685_s9, %s686_s12  ;;  %p692_p4 = scmp.lt.s32.totalorder %s690_s21, %s686_s12 }
  0xd6   : > { %p688_p13 = pnand %p687_p6, %p840_p11  ;;  %p693_p5 = por %p692_p4, %p691_p3 }
  0xd8   : > { %p689_p2 = pneg %p688_p13 }
  0xda   : > { %439 = vperm.xlu1 %636, %v436_v36   ;;  %p694_p7 = pnand %p693_p5, %p689_p2 }
 0x11b   : > { %v394_v22 = vpop.permute.xlu2 %393 }
 0x11c   : > { %v403_v29 = vpack.c.bf16 %v394_v22, %v381_v19 }
 0x123   : > { %v390_v28 = vpop.permute.xlu2 %389 }
 0x12b   : > { %v388_v33 = vpop.permute.xlu2 %387 }
 0x133   : > { %v400_v21 = vpop.permute.xlu0 %399 }
 0x134   : > { %v405_v23 = vpack.c.bf16 %v400_v21, %v400_v21  ;;  %v396_v24 = vpop.permute.xlu1 %395 }
 0x136   : > { %v418_v25 = vsel %vm358_vm0, %v405_v23, 0 }
 0x137   : > { %423 = vmatpush.bf16.msra.mxu1 %v418_v25 }
 0x13b   : > { %v392_v30 = vpop.permute.xlu0 %391 }
 0x13c   : > { %v398_v26 = vpop.permute.xlu1 %397  ;;  %v402_v31 = vpack.c.bf16 %v392_v30, %v390_v28 }
 0x13d   : > { %v404_v27 = vpack.c.bf16 %v398_v26, %v396_v24 }
 0x13f   : > { %424 = vmatpush.bf16.msra.mxu1 %v404_v27 }
 0x143   : > { %425 = vmatpush.bf16.msra.mxu1 %v403_v29  ;;  %v411_v37 = vpop.permute.xlu0 %410 }
 0x144   : > { %v386_v32 = vpop.permute.xlu1 %385 }
 0x145   : > { %v401_v34 = vpack.c.bf16 %v388_v33, %v386_v32 }
 0x147   : > { %426 = vmatpush.bf16.msra.mxu1 %v402_v31 }
 0x14b   : > { %427 = vmatpush.bf16.msra.mxu1 %v401_v34 }
 0x14c   : > { %v440_v45 = vpop.permute.xlu1 %439 }
 0x14e   : > { %567 = vmatmul.msk.bf16.vlgmr.msra.gmra.mxu1 %vm413_vm2, %v406_v35 }
 0x1cb   : > { %v429_v38 = vpop.f32.mrf.mxu1 }
 0x1cc   : > { %v430_v39 = vadd.f32 %v429_v38, %v411_v37 }
 0x1ce   : > { %v433_v40 = vmax.f32 %v430_v39, 0.0 }
 0x1d0   : > { %v435_v41 = vpack.c.bf16 %v433_v40, %v433_v40 }
 0x1d2   : > { %v448_v42 = vsel %vm446_vm3, %v435_v41, 0 }
 0x1d3   : > { %v431_v43 = vpop.f32.mrf.mxu1  ;;  %457 = vmatpush.bf16.msra.mxu2 %v448_v42 }
 0x1d6   : > { %568 = vmatmul.msk.bf16.vlgmr.msra.gmra.mxu2 %vm442_vm4, %v434_v44 }
 0x259   : > { %v459_v46 = vpop.f32.mrf.mxu2 }
 0x25a   : > { %v460_v47 = vadd.f32 %v459_v46, %v440_v45 }
 0x25c   : > { %v463_v48 = vadd.f32 %v460_v47, %v891_v14 }
 0x25e   : > { %v464_v49 = vmax.f32 %v463_v48, 0.0 }
 0x260   : > { %465 = vst [vmem:[%s325_s25] sm:$0xff] %v464_v49 }
 0x261   : > { %v461_v50 = vpop.f32.mrf.mxu2 }
 0x262   : > { %697 = shalt.err (!%p694_p7)
}
 0x263   : > { %580 = dma.vmem_to_hbm [thread:$0]  (%p840_p11), %s480_s15, 128, %s482_s26, %s467_s10  }
 0x264 PF: > { %s493_s23 = sand.u32 1, %s724_s27   ;;  %p587_p8 = pnand %p554_p9, %p844_p12 }
 0x265   : > { %s494_s20 = scalar_lea.sflag [#allocation4], %s493_s23 }
 0x266   : > { %p588_p10 = pneg %p587_p8 }
 0x268   : > { %719 = dma.done.wait (%p588_p10), %s494_s20, 128  }
 0x269   : > { %721 = vsyncadd (%p588_p10), %s494_s20, 4294967168  ;;  %s966_s30 = sld [smem:[#allocation9_spill]]  ;;  %s969_s27 = smov %s728_s28 }
 0x26a   : > { %s967_s29 = sld [smem:[#allocation8_spill]] }
 0x26b   : > { %s968_s11 = sld [smem:[#allocation10_spill]] }
 0x26f   : > { %p21_p0 = scmp.ge.s32.totalorder %s966_s30, 4  }
 0x270   : > { %s970_s28 = smov %s967_s29 }
 0x271   : > { %s971_s29 = smov %s968_s11  ;;  %23 = sbr.rel (!%p21_p0) target bundleno = 5 (0x5), region = 97 }
 0x276   :  { %500 = vsyncpa [#allocation3], 1 }
 0x277   :  { %502 = vsyncpa [#allocation3 + $0x1], 1 }
 0x278   :  { %503 = vsyncpa [#allocation4], 1 }
 0x279   :  { %505 = vsyncpa [#allocation4 + $0x1], 1 }

</bundles_post_ra>
